<compile_context>
chip_gen: v7x
topology: tpu7x:2x2x1
jax: 0.10.0
libtpu: 0.0.40
codegen_flags: <defaults>
</compile_context>

<pallas_src>
import jax
import jax.numpy as jnp
from jax.experimental import pallas as pl
from jax.experimental.pallas import tpu as pltpu

MID = 218        # logical width of the MLP head (matches nn.Linear(H, 218), etc.)
LANE = 128
SUBLANE = 8


def _round_up(x, m):
    return ((x + m - 1) // m) * m


# ----------------------------- Pallas kernel --------------------------------
def mlp_head_kernel(x_ref, w1_ref, b1_ref, w2_ref, b2_ref, w3_ref, b3_ref, o_ref):
    """Fused (Linear -> ReLU) x2 -> Linear on one batch tile.

    x_ref : (TB, H_pad)       bf16  CLS embeddings (zero-padded)
    w*    : (K_pad, N_pad)    bf16  zero-padded, stored (in, out) so y = x @ W + b
    b*    : (1, N_pad)        f32   zero-padded
    o_ref : (TB, OUT_pad)     f32
    """
    x = x_ref[...]  # already bf16 (cast + pad done once in the wrapper)
    h1 = jnp.dot(x, w1_ref[...], preferred_element_type=jnp.float32)
    h1 = jnp.maximum(h1 + b1_ref[...], 0.0)          # f32 elementwise (v5e-safe)
    h2 = jnp.dot(h1.astype(jnp.bfloat16), w2_ref[...],
                 preferred_element_type=jnp.float32)
    h2 = jnp.maximum(h2 + b2_ref[...], 0.0)
    o_ref[...] = jnp.dot(h2.astype(jnp.bfloat16), w3_ref[...],
                         preferred_element_type=jnp.float32) + b3_ref[...]


def _choose_batch_tile(B, h_pad, out_pad):
    """Pick the batch tile: big enough to amortize ~0.35us/step overhead,
    small enough to keep the double-buffered x/o streams well under v7x VMEM,
    and >=2 grid steps for mid/large batches so both v7x TensorCores get work."""
    b8 = _round_up(B, SUBLANE)
    tb = min(1024, b8)
    if 256 <= b8 <= 1024:
        # Split into two tiles: negligible extra step overhead, lets the
        # ("parallel",) grid axis shard across v7x's two TensorCores.
        tb = _round_up(-(-b8 // 2), SUBLANE)

    def stream_bytes(t):  # double-buffered bf16 x tile + f32 o tile
        return 2 * t * (h_pad * 2 + out_pad * 4)

    while tb > SUBLANE and stream_bytes(tb) > 24 * 1024 * 1024:
        tb = _round_up(tb // 2, SUBLANE)
    return tb


def mlp_head(cls_embedding, padded_params, output_dim):
    """Run the fused MLP head over a 1-D batch grid; weights stay resident in VMEM."""
    w1, b1, w2, b2, w3, b3 = padded_params
    B, H = cls_embedding.shape
    H_pad, MID_pad = w1.shape
    OUT_pad = w3.shape[1]

    TB = _choose_batch_tile(B, H_pad, OUT_pad)
    B_pad = _round_up(B, TB)

    # bf16 x stream: halves the HBM->VMEM DMA for the only per-step input.
    x = cls_embedding.astype(jnp.bfloat16)
    x = jnp.pad(x, ((0, B_pad - B), (0, H_pad - H)))

    grid = (B_pad // TB,)

    weight_bytes = sum(int(a.size) * a.dtype.itemsize for a in (w1, b1, w2, b2, w3, b3))
    flops = 2 * B_pad * (H_pad * MID_pad + MID_pad * MID_pad + MID_pad * OUT_pad)
    bytes_accessed = int(x.size) * 2 + weight_bytes + B_pad * OUT_pad * 4

    # Per-step working set: double-buffered x/o tiles + (double-buffered) resident params.
    per_step_vmem = 2 * TB * (H_pad * 2 + OUT_pad * 4) + 2 * weight_bytes
    vmem_limit = int(min(max(2 * per_step_vmem, 16 * 1024 * 1024), 64 * 1024 * 1024))

    resident = lambda a: pl.BlockSpec(a.shape, lambda i: (0, 0))  # same block every step

    out_padded = pl.pallas_call(
        mlp_head_kernel,
        out_shape=jax.ShapeDtypeStruct((B_pad, OUT_pad), jnp.float32),
        grid=grid,
        in_specs=[
            pl.BlockSpec((TB, H_pad), lambda i: (i, 0)),
            resident(w1), resident(b1),
            resident(w2), resident(b2),
            resident(w3), resident(b3),
        ],
        out_specs=pl.BlockSpec((TB, OUT_pad), lambda i: (i, 0)),
        compiler_params=pltpu.CompilerParams(
            dimension_semantics=("parallel",),
            vmem_limit_bytes=vmem_limit),
        cost_estimate=pl.CostEstimate(
            flops=flops, transcendentals=0, bytes_accessed=int(bytes_accessed)),
    )(x, w1, b1, w2, b2, w3, b3)

    return out_padded[:B, :output_dim]


# --------------------------- Parameter handling -------------------------------
def init_params(key, hidden_size, output_dim=218):
    """Logical (unpadded, f32) MLP-head params; shapes transposed vs torch.nn.Linear."""
    ks = jax.random.split(key, 6)

    def linear(kw, kb, fan_in, fan_out):
        bound = 1.0 / jnp.sqrt(fan_in)
        w = jax.random.uniform(kw, (fan_in, fan_out), jnp.float32, -bound, bound)
        b = jax.random.uniform(kb, (1, fan_out), jnp.float32, -bound, bound)
        return w, b

    w1, b1 = linear(ks[0], ks[1], hidden_size, MID)
    w2, b2 = linear(ks[2], ks[3], MID, MID)
    w3, b3 = linear(ks[4], ks[5], MID, output_dim)
    return (w1, b1, w2, b2, w3, b3)


def prepare_params(params):
    """Zero-pad to lane-aligned shapes; weights -> bf16, biases stay f32.

    Zero padding keeps padded hidden units inert (ReLU(0) = 0) and padded
    output lanes exactly 0; the wrapper slices back to output_dim.
    """
    w1, b1, w2, b2, w3, b3 = params
    H = w1.shape[0]
    D = w3.shape[1]
    H_pad = _round_up(H, LANE)
    MID_pad = _round_up(MID, LANE)
    OUT_pad = _round_up(D, LANE)

    def pad_w(w, rows, cols):
        return jnp.pad(w, ((0, rows - w.shape[0]), (0, cols - w.shape[1]))
                       ).astype(jnp.bfloat16)

    def pad_b(b, cols):
        return jnp.pad(b, ((0, 0), (0, cols - b.shape[1]))).astype(jnp.float32)

    return (pad_w(w1, H_pad, MID_pad), pad_b(b1, MID_pad),
            pad_w(w2, MID_pad, MID_pad), pad_b(b2, MID_pad),
            pad_w(w3, MID_pad, OUT_pad), pad_b(b3, OUT_pad))


# -------------------------- Model-level wrapper -------------------------------
def expression_predictor_forward(input_ids, attention_mask, embed_table,
                                 padded_params, output_dim=218):
    """Mirrors ExpressionPredictor.forward.

    # TODO(synk): the frozen `base_model` is an unspecified external HF
    # transformer; its last_hidden_state is simulated with a deterministic
    # embedding lookup. Only the CLS row is gathered (no full (B, S, H)
    # hidden state is materialized).
    # TODO(synk): once the real base_model is wired in, fuse the CLS-row
    # gather into the pallas_call (scalar-prefetched row ids + manual DMA
    # from a pl.ANY hidden-state ref) to avoid one HBM roundtrip of (B, H).
    """
    del attention_mask  # unused by the embedding stand-in
    cls_embedding = embed_table[input_ids[:, 0]].astype(jnp.float32)  # (B, H)
    return mlp_head(cls_embedding, padded_params, output_dim)          # (B, output_dim)


# ----------------------------------- main ------------------------------------
if __name__ == "__main__":
    batch = 2
    seq = 8
    hidden_size = 32
    vocab_size = 64
    output_dim = 218

    key = jax.random.PRNGKey(0)
    k_ids, k_embed, k_params = jax.random.split(key, 3)

    input_ids = jax.random.randint(k_ids, (batch, seq), 0, vocab_size, dtype=jnp.int32)
    attention_mask = jnp.ones((batch, seq), dtype=jnp.int32)

    # "Frozen base model" stand-in: deterministic embedding table.
    embed_table = jax.random.normal(k_embed, (vocab_size, hidden_size), jnp.float32)

    params = init_params(k_params, hidden_size, output_dim)
    padded_params = prepare_params(params)

    out = expression_predictor_forward(input_ids, attention_mask, embed_table,
                                       padded_params, output_dim)
    out = jax.block_until_ready(out)

    assert out.shape == (batch, output_dim), out.shape
    assert out.dtype == jnp.float32

    # Pure-JAX reference using the same bf16-operand / f32-accumulate recipe.
    w1, b1, w2, b2, w3, b3 = params
    cls = embed_table[input_ids[:, 0]].astype(jnp.float32)

    def bd(a, w):
        return jnp.dot(a.astype(jnp.bfloat16), w.astype(jnp.bfloat16),
                       preferred_element_type=jnp.float32)

    ref = jnp.maximum(bd(cls, w1) + b1, 0.0)
    ref = jnp.maximum(bd(ref, w2) + b2, 0.0)
    ref = bd(ref, w3) + b3

    assert jnp.allclose(out, ref, atol=1e-2, rtol=1e-2), float(jnp.max(jnp.abs(out - ref)))

    print("KERNEL_OK")
</pallas_src>

<mosaic_0001>
module attributes {stable_mosaic.version = 11 : i64} {
  func.func @mlp_head_kernel(%arg0: i32, %arg1: memref<8x128xbf16, #tpu.memory_space<vmem>>, %arg2: memref<128x256xbf16, #tpu.memory_space<vmem>>, %arg3: memref<1x256xf32, #tpu.memory_space<vmem>>, %arg4: memref<256x256xbf16, #tpu.memory_space<vmem>>, %arg5: memref<1x256xf32, #tpu.memory_space<vmem>>, %arg6: memref<256x256xbf16, #tpu.memory_space<vmem>>, %arg7: memref<1x256xf32, #tpu.memory_space<vmem>>, %arg8: memref<8x256xf32, #tpu.memory_space<vmem>>) attributes {dimension_semantics = [#tpu.dimension_semantics<parallel>], iteration_bounds = array<i64: 1>, scalar_prefetch = 0 : i64, scratch_operands = 0 : i64, tpu.core_type = #tpu.core_type<tc>, window_params = [{transform_indices = @transform_0, window_bounds = array<i64: 8, 128>}, {pipeline_mode = #tpu.pipeline_mode<synchronous>, transform_indices = @transform_1, window_bounds = array<i64: 128, 256>}, {pipeline_mode = #tpu.pipeline_mode<synchronous>, transform_indices = @transform_2, window_bounds = array<i64: 1, 256>}, {pipeline_mode = #tpu.pipeline_mode<synchronous>, transform_indices = @transform_3, window_bounds = array<i64: 256, 256>}, {pipeline_mode = #tpu.pipeline_mode<synchronous>, transform_indices = @transform_4, window_bounds = array<i64: 1, 256>}, {pipeline_mode = #tpu.pipeline_mode<synchronous>, transform_indices = @transform_5, window_bounds = array<i64: 256, 256>}, {pipeline_mode = #tpu.pipeline_mode<synchronous>, transform_indices = @transform_6, window_bounds = array<i64: 1, 256>}, {transform_indices = @transform_7, window_bounds = array<i64: 8, 256>}]} {
    %c0 = arith.constant 0 : index
    %c0_0 = arith.constant 0 : index
    %0 = vector.load %arg1[%c0, %c0_0] : memref<8x128xbf16, #tpu.memory_space<vmem>>, vector<8x128xbf16>
    %c0_1 = arith.constant 0 : index
    %c0_2 = arith.constant 0 : index
    %1 = vector.load %arg2[%c0_1, %c0_2] : memref<128x256xbf16, #tpu.memory_space<vmem>>, vector<128x256xbf16>
    %cst = arith.constant dense<0.000000e+00> : vector<8x256xf32>
    %2 = tpu.matmul %0, %1, %cst {dimension_numbers = #tpu.dot_dimension_numbers<[1], [0], [0], [1], [0, 0, 1, 1], [], []>} : vector<8x128xbf16>, vector<128x256xbf16>, vector<8x256xf32> -> vector<8x256xf32>
    %c0_3 = arith.constant 0 : index
    %c0_4 = arith.constant 0 : index
    %3 = vector.load %arg3[%c0_3, %c0_4] : memref<1x256xf32, #tpu.memory_space<vmem>>, vector<1x256xf32>
    %4 = vector.broadcast %3 : vector<1x256xf32> to vector<8x256xf32>
    %5 = arith.addf %2, %4 : vector<8x256xf32>
    %cst_5 = arith.constant 0.000000e+00 : f32
    %6 = vector.broadcast %cst_5 : f32 to vector<8x256xf32>
    %7 = arith.maximumf %5, %6 : vector<8x256xf32>
    %8 = arith.truncf %7 : vector<8x256xf32> to vector<8x256xbf16>
    %c0_6 = arith.constant 0 : index
    %c0_7 = arith.constant 0 : index
    %9 = vector.load %arg4[%c0_6, %c0_7] : memref<256x256xbf16, #tpu.memory_space<vmem>>, vector<256x256xbf16>
    %cst_8 = arith.constant dense<0.000000e+00> : vector<8x256xf32>
    %10 = tpu.matmul %8, %9, %cst_8 {dimension_numbers = #tpu.dot_dimension_numbers<[1], [0], [0], [1], [0, 0, 1, 1], [], []>} : vector<8x256xbf16>, vector<256x256xbf16>, vector<8x256xf32> -> vector<8x256xf32>
    %c0_9 = arith.constant 0 : index
    %c0_10 = arith.constant 0 : index
    %11 = vector.load %arg5[%c0_9, %c0_10] : memref<1x256xf32, #tpu.memory_space<vmem>>, vector<1x256xf32>
    %12 = vector.broadcast %11 : vector<1x256xf32> to vector<8x256xf32>
    %13 = arith.addf %10, %12 : vector<8x256xf32>
    %cst_11 = arith.constant 0.000000e+00 : f32
    %14 = vector.broadcast %cst_11 : f32 to vector<8x256xf32>
    %15 = arith.maximumf %13, %14 : vector<8x256xf32>
    %16 = arith.truncf %15 : vector<8x256xf32> to vector<8x256xbf16>
    %c0_12 = arith.constant 0 : index
    %c0_13 = arith.constant 0 : index
    %17 = vector.load %arg6[%c0_12, %c0_13] : memref<256x256xbf16, #tpu.memory_space<vmem>>, vector<256x256xbf16>
    %cst_14 = arith.constant dense<0.000000e+00> : vector<8x256xf32>
    %18 = tpu.matmul %16, %17, %cst_14 {dimension_numbers = #tpu.dot_dimension_numbers<[1], [0], [0], [1], [0, 0, 1, 1], [], []>} : vector<8x256xbf16>, vector<256x256xbf16>, vector<8x256xf32> -> vector<8x256xf32>
    %c0_15 = arith.constant 0 : index
    %c0_16 = arith.constant 0 : index
    %19 = vector.load %arg7[%c0_15, %c0_16] : memref<1x256xf32, #tpu.memory_space<vmem>>, vector<1x256xf32>
    %20 = vector.broadcast %19 : vector<1x256xf32> to vector<8x256xf32>
    %21 = arith.addf %18, %20 : vector<8x256xf32>
    %c0_17 = arith.constant 0 : index
    %c0_18 = arith.constant 0 : index
    %22 = vector.load %arg8[%c0_17, %c0_18] : memref<8x256xf32, #tpu.memory_space<vmem>>, vector<8x256xf32>
    tpu.vector_store %arg8[%c0_17, %c0_18], %21 {strides = array<i32>} : memref<8x256xf32, #tpu.memory_space<vmem>>, vector<8x256xf32>,
    return
  }
  func.func @transform_0(%arg0: i32) -> (i32, i32) {
    %c0_i32 = arith.constant 0 : i32
    %c0_i32_0 = arith.constant 0 : i32
    return %arg0, %c0_i32 : i32, i32
  }
  func.func @transform_1(%arg0: i32) -> (i32, i32) {
    %c0_i32 = arith.constant 0 : i32
    %c0_i32_0 = arith.constant 0 : i32
    %c0_i32_1 = arith.constant 0 : i32
    return %c0_i32, %c0_i32_0 : i32, i32
  }
  func.func @transform_2(%arg0: i32) -> (i32, i32) {
    %c0_i32 = arith.constant 0 : i32
    %c0_i32_0 = arith.constant 0 : i32
    %c0_i32_1 = arith.constant 0 : i32
    return %c0_i32, %c0_i32_0 : i32, i32
  }
  func.func @transform_3(%arg0: i32) -> (i32, i32) {
    %c0_i32 = arith.constant 0 : i32
    %c0_i32_0 = arith.constant 0 : i32
    %c0_i32_1 = arith.constant 0 : i32
    return %c0_i32, %c0_i32_0 : i32, i32
  }
  func.func @transform_4(%arg0: i32) -> (i32, i32) {
    %c0_i32 = arith.constant 0 : i32
    %c0_i32_0 = arith.constant 0 : i32
    %c0_i32_1 = arith.constant 0 : i32
    return %c0_i32, %c0_i32_0 : i32, i32
  }
  func.func @transform_5(%arg0: i32) -> (i32, i32) {
    %c0_i32 = arith.constant 0 : i32
    %c0_i32_0 = arith.constant 0 : i32
    %c0_i32_1 = arith.constant 0 : i32
    return %c0_i32, %c0_i32_0 : i32, i32
  }
  func.func @transform_6(%arg0: i32) -> (i32, i32) {
    %c0_i32 = arith.constant 0 : i32
    %c0_i32_0 = arith.constant 0 : i32
    %c0_i32_1 = arith.constant 0 : i32
    return %c0_i32, %c0_i32_0 : i32, i32
  }
  func.func @transform_7(%arg0: i32) -> (i32, i32) {
    %c0_i32 = arith.constant 0 : i32
    %c0_i32_0 = arith.constant 0 : i32
    return %arg0, %c0_i32 : i32, i32
  }
}

</mosaic_0001>

<bundles_post_ra>
// kernel: tpu_custom_call.1
= control target key start
LH: loop header
LB: loop body
LE: loop exit
PB: predicated region body
PF: predicated region fallthrough
CT: control target
= control target key end

     0   :  { %12 = vsyncpa [#allocation3], 0  ;;  %s1200_s0 = inlined_call_operand.hbm [shape: bf16[8,128], index: 0, kind: input, shape index: {}]   ;;  %s1201_s1 = inlined_call_operand.hbm [shape: bf16[128,256], index: 1, kind: input, shape index: {}]   ;;  %s1202_s2 = inlined_call_operand.vmem [shape: f32[1,256], index: 2, kind: input, shape index: {}]   ;;  %s1203_s3 = inlined_call_operand.hbm [shape: bf16[256,256], index: 3, kind: input, shape index: {}]   ;;  %s1204_s4 = inlined_call_operand.vmem [shape: f32[1,256], index: 4, kind: input, shape index: {}]   ;;  %s1205_s5 = inlined_call_operand.hbm [shape: bf16[256,256], index: 5, kind: input, shape index: {}]   ;;  %s1206_s6 = inlined_call_operand.vmem [shape: f32[1,256], index: 6, kind: input, shape index: {}]   ;;  %s1207_s7 = inlined_call_operand.hbm [shape: f32[8,256], index: 7, kind: output, shape index: {}]  }
   0x1   :  { %13 = vsyncpa [#allocation6], 0 }
   0x2   :  { %14 = vsyncpa [#allocation9], 0 }
   0x3   :  { %15 = vsyncpa [#allocation4], 0  ;;  %s1074_s24 = smov [#allocation5]   ;;  %s956_s28 = scalar_lea.hbm %s1201_s1, 2048 }
   0x4   :  { %s31_s25 = sshll.u32 %s1074_s24, 4  ;;  %p957_p0 = scmp.ne.s32.totalorder %s1201_s1, %s956_s28  ;;  %s32_s25 = int_to_ptr.vmem [resolvable:$true] %s31_s25 }
   0x5   :  { %p960_p1 = scmp.lt.u32.totalorder %s956_s28, %s1201_s1 }
   0x7   :  { %p962_p2 = pnand %p960_p1, %p957_p0 }
   0x9   :  { %965 = shalt.err (!%p962_p2)
}
   0xa   :  { %s966_s10 = scalar_lea.vmem %s32_s25, 2048  ;;  %p971_p4 = scmp.lt.s32.totalorder %s32_s25, %s32_s25 }
   0xb   :  { %p967_p3 = scmp.ne.s32.totalorder %s32_s25, %s966_s10  ;;  %p972_p5 = scmp.lt.s32.totalorder %s966_s10, %s966_s10 }
   0xd   :  { %p973_p6 = por %p972_p5, %p971_p4 }
   0xf   :  { %p974_p7 = pnand %p973_p6, %p967_p3 }
  0x11   :  { %977 = shalt.err (!%p974_p7)
}
  0x12   :  { %s1075_s11 = smov 128   ;;  %s1076_s12 = smov 8  }
  0x13   :  { %37 = dma.hbm_to_vmem [thread:$0]  %s1201_s1, 2048, %s32_s25, [#allocation6], %s1075_s11, %s1075_s11, %s1076_s12  }
  0x14   :  { %s1077_s15 = smov [#allocation2]   ;;  %s1078_s17 = smov [#allocation7]  }
  0x15   :  { %s22_s16 = sshll.u32 %s1077_s15, 4  ;;  %s45_s18 = sshll.u32 %s1078_s17, 4  ;;  %s23_s16 = int_to_ptr.vmem [resolvable:$true] %s22_s16  ;;  %s46_s18 = int_to_ptr.vmem [resolvable:$true] %s45_s18 }
  0x16   :  { %s978_s21 = scalar_lea.hbm %s1200_s0, 64 }
  0x17   :  { %p979_p8 = scmp.ne.s32.totalorder %s1200_s0, %s978_s21  ;;  %p982_p9 = scmp.lt.u32.totalorder %s978_s21, %s1200_s0 }
  0x19   :  { %p984_p10 = pnand %p982_p9, %p979_p8 }
  0x1b   :  { %987 = shalt.err (!%p984_p10)
}
  0x1c   :  { %s988_s1 = scalar_lea.vmem %s23_s16, 64  ;;  %p993_p12 = scmp.lt.s32.totalorder %s23_s16, %s23_s16 }
  0x1d   :  { %p989_p11 = scmp.ne.s32.totalorder %s23_s16, %s988_s1  ;;  %p994_p13 = scmp.lt.s32.totalorder %s988_s1, %s988_s1 }
  0x1f   :  { %p995_p0 = por %p994_p13, %p993_p12 }
  0x21   :  { %p996_p1 = pnand %p995_p0, %p989_p11 }
  0x23   :  { %999 = shalt.err (!%p996_p1)
}
  0x24   :  { %25 = dma.hbm_to_vmem [thread:$0]  %s1200_s0, 64, %s23_s16, [#allocation3]  }
  0x25   :  { %s1000_s30 = scalar_lea.hbm %s1203_s3, 4096 }
  0x26   :  { %p1001_p2 = scmp.ne.s32.totalorder %s1203_s3, %s1000_s30  ;;  %p1004_p3 = scmp.lt.u32.totalorder %s1000_s30, %s1203_s3 }
  0x28   :  { %p1006_p4 = pnand %p1004_p3, %p1001_p2 }
  0x2a   :  { %1009 = shalt.err (!%p1006_p4)
}
  0x2b   :  { %s1010_s14 = scalar_lea.vmem %s46_s18, 4096  ;;  %p1015_p6 = scmp.lt.s32.totalorder %s46_s18, %s46_s18 }
  0x2c   :  { %p1011_p5 = scmp.ne.s32.totalorder %s46_s18, %s1010_s14  ;;  %p1016_p7 = scmp.lt.s32.totalorder %s1010_s14, %s1010_s14 }
  0x2e   :  { %p1017_p8 = por %p1016_p7, %p1015_p6 }
  0x30   :  { %p1018_p9 = pnand %p1017_p8, %p1011_p5 }
  0x32   :  { %1021 = shalt.err (!%p1018_p9)
}
  0x33   :  { %51 = dma.hbm_to_vmem [thread:$0]  %s1203_s3, 4096, %s46_s18, [#allocation6], %s1075_s11, %s1075_s11, %s1076_s12  }
  0x34   :  { %s1079_s16 = smov [#allocation8]   ;;  %s1022_s21 = scalar_lea.hbm %s1205_s5, 4096 }
  0x35   :  { %s59_s17 = sshll.u32 %s1079_s16, 4  ;;  %p1023_p10 = scmp.ne.s32.totalorder %s1205_s5, %s1022_s21  ;;  %s60_s17 = int_to_ptr.vmem [resolvable:$true] %s59_s17 }
  0x36   :  { %p1026_p11 = scmp.lt.u32.totalorder %s1022_s21, %s1205_s5 }
  0x38   :  { %p1028_p12 = pnand %p1026_p11, %p1023_p10 }
  0x3a   :  { %1031 = shalt.err (!%p1028_p12)
}
  0x3b   :  { %s1032_s1 = scalar_lea.vmem %s60_s17, 4096  ;;  %p1037_p0 = scmp.lt.s32.totalorder %s60_s17, %s60_s17 }
  0x3c   :  { %p1033_p13 = scmp.ne.s32.totalorder %s60_s17, %s1032_s1  ;;  %p1038_p1 = scmp.lt.s32.totalorder %s1032_s1, %s1032_s1 }
  0x3e   :  { %p1039_p2 = por %p1038_p1, %p1037_p0 }
  0x40   :  { %p1040_p3 = pnand %p1039_p2, %p1033_p13 }
  0x42   :  { %1043 = shalt.err (!%p1040_p3)
}
  0x43   :  { %65 = dma.hbm_to_vmem [thread:$0]  %s1205_s5, 4096, %s60_s17, [#allocation9], %s1075_s11, %s1075_s11, %s1076_s12  }
  0x44   :  { %1066 = dma.done.wait [#allocation3], 64  }
  0x45   :  { %1067 = vsyncadd [#allocation3], 4294967232 }
  0x46   :  { %1068 = dma.done.wait [#allocation6], 6144  }
  0x47   :  { %1069 = vsyncadd [#allocation6], 4294961152 }
  0x48   :  { %1070 = dma.done.wait [#allocation9], 4096  }
  0x49   :  { %1071 = vsyncadd [#allocation9], 4294963200  ;;  %v1080_v0 = vmov 0   ;;  %v836_v1 = vld [vmem:[#allocation5 + $0x4] ss:$8 sps:$4 sm:$0xff]  }
  0x4a   :  { %222 = vmatprep.mubr.bf16.mxu0 %v1080_v0  ;;  %v838_v2 = vld [vmem:[#allocation5] ss:$8 sps:$4 sm:$0xff]   ;;  %190 = vmatprep.subr.bf16.mxu0 %v836_v1  ;;  %v839_v3 = vld [vmem:[#allocation5 + $0x14] ss:$8 sps:$4 sm:$0xff]   ;;  %v841_v4 = vld [vmem:[#allocation5 + $0x10] ss:$8 sps:$4 sm:$0xff]  }
  0x4b   :  { %191 = vmatpush1.bf16.msra.mxu0 %v838_v2  ;;  %v842_v5 = vld [vmem:[#allocation5 + $0x24] ss:$8 sps:$4 sm:$0xff]   ;;  %v844_v6 = vld [vmem:[#allocation5 + $0x20] ss:$8 sps:$4 sm:$0xff]   ;;  %v845_v7 = vld [vmem:[#allocation5 + $0x34] ss:$8 sps:$4 sm:$0xff]  }
  0x4c   :  { %192 = vmatprep.subr.bf16.mxu0 %v839_v3  ;;  %v847_v8 = vld [vmem:[#allocation5 + $0x30] ss:$8 sps:$4 sm:$0xff]   ;;  %v848_v9 = vld [vmem:[#allocation5 + $0x44] ss:$8 sps:$4 sm:$0xff]   ;;  %v862_v11 = vld [vmem:[#allocation7] ss:$8 sps:$4 sm:$0xff]  }
  0x4d   :  { %v860_v10 = vld [vmem:[#allocation7 + $0x4] ss:$8 sps:$4 sm:$0xff]   ;;  %v863_v12 = vld [vmem:[#allocation7 + $0x14] ss:$8 sps:$4 sm:$0xff]   ;;  %v850_v13 = vld [vmem:[#allocation5 + $0x40] ss:$8 sps:$4 sm:$0xff]  }
  0x4e   :  { %439 = vmatprep.subr.bf16.mxu1 %v860_v10  ;;  %v865_v14 = vld [vmem:[#allocation7 + $0x10] ss:$8 sps:$4 sm:$0xff]   ;;  %v866_v15 = vld [vmem:[#allocation7 + $0x24] ss:$8 sps:$4 sm:$0xff]   ;;  %v851_v16 = vld [vmem:[#allocation5 + $0x54] ss:$8 sps:$4 sm:$0xff]  }
  0x4f   :  { %193 = vmatpush1.bf16.msra.mxu0 %v841_v4  ;;  %440 = vmatpush1.bf16.msra.mxu1 %v862_v11  ;;  %v853_v17 = vld [vmem:[#allocation5 + $0x50] ss:$8 sps:$4 sm:$0xff]   ;;  %v868_v18 = vld [vmem:[#allocation7 + $0x20] ss:$8 sps:$4 sm:$0xff]   ;;  %v869_v19 = vld [vmem:[#allocation7 + $0x34] ss:$8 sps:$4 sm:$0xff]  }
  0x50   :  { %194 = vmatprep.subr.bf16.mxu0 %v842_v5  ;;  %441 = vmatprep.subr.bf16.mxu1 %v863_v12  ;;  %v854_v20 = vld [vmem:[#allocation5 + $0x64] ss:$8 sps:$4 sm:$0xff]   ;;  %v856_v21 = vld [vmem:[#allocation5 + $0x60] ss:$8 sps:$4 sm:$0xff]   ;;  %v871_v22 = vld [vmem:[#allocation7 + $0x30] ss:$8 sps:$4 sm:$0xff]  }
  0x51   :  { %v872_v23 = vld [vmem:[#allocation7 + $0x44] ss:$8 sps:$4 sm:$0xff]   ;;  %v857_v24 = vld [vmem:[#allocation5 + $0x74] ss:$8 sps:$4 sm:$0xff]   ;;  %v859_v25 = vld [vmem:[#allocation5 + $0x70] ss:$8 sps:$4 sm:$0xff]  }
  0x52   :  { %v874_v26 = vld [vmem:[#allocation7 + $0x40] ss:$8 sps:$4 sm:$0xff]   ;;  %v875_v27 = vld [vmem:[#allocation7 + $0x54] ss:$8 sps:$4 sm:$0xff]   ;;  %v877_v29 = vld [vmem:[#allocation7 + $0x50] ss:$8 sps:$4 sm:$0xff]  }
  0x53   :  { %195 = vmatpush1.bf16.msra.mxu0 %v844_v6  ;;  %442 = vmatpush1.bf16.msra.mxu1 %v865_v14  ;;  %v81_v28 = vld [vmem:[#allocation2] sm:$0xf]  ;;  %v878_v30 = vld [vmem:[#allocation7 + $0x64] ss:$8 sps:$4 sm:$0xff]   ;;  %v880_v31 = vld [vmem:[#allocation7 + $0x60] ss:$8 sps:$4 sm:$0xff]   ;;  %v100_v14 = vlaneseq }
  0x54   :  { %196 = vmatprep.subr.bf16.mxu0 %v845_v7  ;;  %443 = vmatprep.subr.bf16.mxu1 %v866_v15  ;;  %v881_v32 = vld [vmem:[#allocation7 + $0x74] ss:$8 sps:$4 sm:$0xff]   ;;  %v883_v33 = vld [vmem:[#allocation7 + $0x70] ss:$8 sps:$4 sm:$0xff]   ;;  %v884_v34 = vld [vmem:[#allocation7 + $0x84] ss:$8 sps:$4 sm:$0xff]  }
  0x55   :  { %v886_v35 = vld [vmem:[#allocation7 + $0x80] ss:$8 sps:$4 sm:$0xff]   ;;  %v887_v36 = vld [vmem:[#allocation7 + $0x94] ss:$8 sps:$4 sm:$0xff]   ;;  %v889_v37 = vld [vmem:[#allocation7 + $0x90] ss:$8 sps:$4 sm:$0xff]  }
  0x56   :  { %v890_v38 = vld [vmem:[#allocation7 + $0xa4] ss:$8 sps:$4 sm:$0xff]   ;;  %v892_v39 = vld [vmem:[#allocation7 + $0xa0] ss:$8 sps:$4 sm:$0xff]   ;;  %v893_v40 = vld [vmem:[#allocation7 + $0xb4] ss:$8 sps:$4 sm:$0xff]  }
  0x57   :  { %197 = vmatpush1.bf16.msra.mxu0 %v847_v8  ;;  %444 = vmatpush1.bf16.msra.mxu1 %v868_v18  ;;  %v895_v41 = vld [vmem:[#allocation7 + $0xb0] ss:$8 sps:$4 sm:$0xff]   ;;  %v896_v42 = vld [vmem:[#allocation7 + $0xc4] ss:$8 sps:$4 sm:$0xff]   ;;  %v898_v43 = vld [vmem:[#allocation7 + $0xc0] ss:$8 sps:$4 sm:$0xff]  }
  0x58   :  { %198 = vmatprep.subr.bf16.mxu0 %v848_v9  ;;  %445 = vmatprep.subr.bf16.mxu1 %v869_v19  ;;  %v899_v44 = vld [vmem:[#allocation7 + $0xd4] ss:$8 sps:$4 sm:$0xff]   ;;  %v901_v45 = vld [vmem:[#allocation7 + $0xd0] ss:$8 sps:$4 sm:$0xff]   ;;  %v902_v46 = vld [vmem:[#allocation7 + $0xe4] ss:$8 sps:$4 sm:$0xff]  }
  0x59   :  { %v904_v47 = vld [vmem:[#allocation7 + $0xe0] ss:$8 sps:$4 sm:$0xff]   ;;  %v905_v48 = vld [vmem:[#allocation7 + $0xf4] ss:$8 sps:$4 sm:$0xff]   ;;  %v907_v49 = vld [vmem:[#allocation7 + $0xf0] ss:$8 sps:$4 sm:$0xff]  }
  0x5a   :  { %v908_v50 = vld [vmem:[#allocation8] ss:$8 sps:$4 sm:$0xff]   ;;  %v910_v51 = vld [vmem:[#allocation8 + $0x4] ss:$8 sps:$4 sm:$0xff]   ;;  %v913_v52 = vld [vmem:[#allocation8 + $0x14] ss:$8 sps:$4 sm:$0xff]  }
  0x5b   :  { %199 = vmatpush1.bf16.msra.mxu0 %v850_v13  ;;  %446 = vmatpush1.bf16.msra.mxu1 %v871_v22  ;;  %v911_v53 = vld [vmem:[#allocation8 + $0x10] ss:$8 sps:$4 sm:$0xff]   ;;  %v916_v54 = vld [vmem:[#allocation8 + $0x24] ss:$8 sps:$4 sm:$0xff]   ;;  %v914_v55 = vld [vmem:[#allocation8 + $0x20] ss:$8 sps:$4 sm:$0xff]  }
  0x5c   :  { %200 = vmatprep.subr.bf16.mxu0 %v851_v16  ;;  %447 = vmatprep.subr.bf16.mxu1 %v872_v23  ;;  %v919_v56 = vld [vmem:[#allocation8 + $0x34] ss:$8 sps:$4 sm:$0xff]   ;;  %v917_v57 = vld [vmem:[#allocation8 + $0x30] ss:$8 sps:$4 sm:$0xff]   ;;  %v922_v58 = vld [vmem:[#allocation8 + $0x44] ss:$8 sps:$4 sm:$0xff]  }
  0x5d   :  { %v920_v59 = vld [vmem:[#allocation8 + $0x40] ss:$8 sps:$4 sm:$0xff]   ;;  %v925_v60 = vld [vmem:[#allocation8 + $0x54] ss:$8 sps:$4 sm:$0xff]   ;;  %v923_v61 = vld [vmem:[#allocation8 + $0x50] ss:$8 sps:$4 sm:$0xff]  }
  0x5e   :  { %v928_v62 = vld [vmem:[#allocation8 + $0x64] ss:$8 sps:$4 sm:$0xff]   ;;  %v926_v63 = vld [vmem:[#allocation8 + $0x60] ss:$8 sps:$4 sm:$0xff]   ;;  %v931_v0 = vld [vmem:[#allocation8 + $0x74] ss:$8 sps:$4 sm:$0xff]  }
  0x5f   :  { %201 = vmatpush1.bf16.msra.mxu0 %v853_v17  ;;  %448 = vmatpush1.bf16.msra.mxu1 %v874_v26  ;;  %v929_v1 = vld [vmem:[#allocation8 + $0x70] ss:$8 sps:$4 sm:$0xff]   ;;  %v934_v2 = vld [vmem:[#allocation8 + $0x84] ss:$8 sps:$4 sm:$0xff]   ;;  %v932_v3 = vld [vmem:[#allocation8 + $0x80] ss:$8 sps:$4 sm:$0xff]  }
  0x60   :  { %202 = vmatprep.subr.bf16.mxu0 %v854_v20  ;;  %449 = vmatprep.subr.bf16.mxu1 %v875_v27  ;;  %v937_v4 = vld [vmem:[#allocation8 + $0x94] ss:$8 sps:$4 sm:$0xff]   ;;  %v935_v5 = vld [vmem:[#allocation8 + $0x90] ss:$8 sps:$4 sm:$0xff]   ;;  %v940_v6 = vld [vmem:[#allocation8 + $0xa4] ss:$8 sps:$4 sm:$0xff]  }
  0x61   :  { %v938_v7 = vld [vmem:[#allocation8 + $0xa0] ss:$8 sps:$4 sm:$0xff]   ;;  %v943_v8 = vld [vmem:[#allocation8 + $0xb4] ss:$8 sps:$4 sm:$0xff]   ;;  %v941_v9 = vld [vmem:[#allocation8 + $0xb0] ss:$8 sps:$4 sm:$0xff]  }
  0x62   :  { %v946_v10 = vld [vmem:[#allocation8 + $0xc4] ss:$8 sps:$4 sm:$0xff]   ;;  %v944_v11 = vld [vmem:[#allocation8 + $0xc0] ss:$8 sps:$4 sm:$0xff]   ;;  %v949_v12 = vld [vmem:[#allocation8 + $0xd4] ss:$8 sps:$4 sm:$0xff]  }
  0x63   :  { %203 = vmatpush1.bf16.msra.mxu0 %v856_v21  ;;  %450 = vmatpush1.bf16.msra.mxu1 %v877_v29  ;;  %v947_v13 = vld [vmem:[#allocation8 + $0xd0] ss:$8 sps:$4 sm:$0xff]   ;;  %v101_v15 = vshrl.u32 %v100_v14, 7  ;;  %v98_v17 = vld [vmem:[%s1202_s2] sm:$0x3] }
  0x64   :  { %204 = vmatprep.subr.bf16.mxu0 %v857_v24  ;;  %451 = vmatprep.subr.bf16.mxu1 %v878_v30 }
  0x65   :  { %v102_v16 = vsub.s32 0, %v101_v15  ;;  %v106_v18 = vsub.s32 1, %v101_v15 }
  0x67   :  { %205 = vmatpush1.bf16.msra.mxu0 %v859_v25  ;;  %452 = vmatpush1.bf16.msra.mxu1 %v880_v31  ;;  %v103_v19 = vrot.slane %v98_v17, %v102_v16  ;;  %v107_v20 = vrot.slane %v98_v17, %v106_v18  ;;  %v952_v31 = vld [vmem:[#allocation8 + $0xe4] ss:$8 sps:$4 sm:$0xff]  }
  0x68   :  { %453 = vmatprep.subr.bf16.mxu1 %v881_v32  ;;  %688 = vmatprep.subr.bf16.mxu0 %v910_v51  ;;  %v950_v32 = vld [vmem:[#allocation8 + $0xe0] ss:$8 sps:$4 sm:$0xff]  }
  0x6a   :  { %223 = vmatmul.mubr.bf16.vlgmr.msra.gmra.mrb[0].mxu0 %v81_v28 }
  0x6b   :  { %454 = vmatpush1.bf16.msra.mxu1 %v883_v33  ;;  %689 = vmatpush1.bf16.msra.mxu0 %v908_v50  ;;  %v955_v33 = vld [vmem:[#allocation8 + $0xf4] ss:$8 sps:$4 sm:$0xff]  }
  0x6c   :  { %455 = vmatprep.subr.bf16.mxu1 %v884_v34  ;;  %690 = vmatprep.subr.bf16.mxu0 %v913_v52  ;;  %v953_v34 = vld [vmem:[#allocation8 + $0xf0] ss:$8 sps:$4 sm:$0xff]  }
  0x6f   :  { %456 = vmatpush1.bf16.msra.mxu1 %v886_v35  ;;  %691 = vmatpush1.bf16.msra.mxu0 %v911_v53  ;;  %v267_v35 = vld [vmem:[%s1204_s4] sm:$0x3]  ;;  %s1081_s4 = smov [#allocation10]  }
  0x70   :  { %457 = vmatprep.subr.bf16.mxu1 %v887_v36  ;;  %692 = vmatprep.subr.bf16.mxu0 %v916_v54  ;;  %v272_v36 = vrot.slane %v267_v35, %v102_v16  ;;  %s737_s28 = sshll.u32 %s1081_s4, 4  ;;  %s738_s28 = int_to_ptr.vmem [resolvable:$true] %s737_s28 }
  0x71   :  { %s1044_s29 = scalar_lea.vmem %s738_s28, 256  ;;  %p1049_p5 = scmp.lt.s32.totalorder %s738_s28, %s738_s28 }
  0x72   :  { %p1045_p4 = scmp.ne.s32.totalorder %s738_s28, %s1044_s29  ;;  %p1050_p6 = scmp.lt.s32.totalorder %s1044_s29, %s1044_s29 }
  0x73   :  { %458 = vmatpush1.bf16.msra.mxu1 %v889_v37  ;;  %693 = vmatpush1.bf16.msra.mxu0 %v914_v55  ;;  %v276_v37 = vrot.slane %v267_v35, %v106_v18 }
  0x74   :  { %459 = vmatprep.subr.bf16.mxu1 %v890_v38  ;;  %694 = vmatprep.subr.bf16.mxu0 %v919_v56  ;;  %p1051_p7 = por %p1050_p6, %p1049_p5 }
  0x76   :  { %p1052_p8 = pnand %p1051_p7, %p1045_p4 }
  0x77   :  { %460 = vmatpush1.bf16.msra.mxu1 %v892_v39  ;;  %695 = vmatpush1.bf16.msra.mxu0 %v917_v57 }
  0x78   :  { %461 = vmatprep.subr.bf16.mxu1 %v893_v40  ;;  %696 = vmatprep.subr.bf16.mxu0 %v922_v58 }
  0x7b   :  { %462 = vmatpush1.bf16.msra.mxu1 %v895_v41  ;;  %697 = vmatpush1.bf16.msra.mxu0 %v920_v59 }
  0x7c   :  { %463 = vmatprep.subr.bf16.mxu1 %v896_v42  ;;  %698 = vmatprep.subr.bf16.mxu0 %v925_v60 }
  0x7f   :  { %464 = vmatpush1.bf16.msra.mxu1 %v898_v43  ;;  %699 = vmatpush1.bf16.msra.mxu0 %v923_v61 }
  0x80   :  { %465 = vmatprep.subr.bf16.mxu1 %v899_v44  ;;  %700 = vmatprep.subr.bf16.mxu0 %v928_v62 }
  0x83   :  { %466 = vmatpush1.bf16.msra.mxu1 %v901_v45  ;;  %701 = vmatpush1.bf16.msra.mxu0 %v926_v63 }
  0x84   :  { %467 = vmatprep.subr.bf16.mxu1 %v902_v46  ;;  %702 = vmatprep.subr.bf16.mxu0 %v931_v0 }
  0x87   :  { %468 = vmatpush1.bf16.msra.mxu1 %v904_v47  ;;  %703 = vmatpush1.bf16.msra.mxu0 %v929_v1 }
  0x88   :  { %469 = vmatprep.subr.bf16.mxu1 %v905_v48  ;;  %704 = vmatprep.subr.bf16.mxu0 %v934_v2  ;;  %v516_v48 = vld [vmem:[%s1206_s6] sm:$0x3] }
  0x89   :  { %v525_v50 = vrot.slane %v516_v48, %v106_v18 }
  0x8b   :  { %470 = vmatpush1.bf16.msra.mxu1 %v907_v49  ;;  %705 = vmatpush1.bf16.msra.mxu0 %v932_v3  ;;  %v521_v49 = vrot.slane %v516_v48, %v102_v16 }
  0x8c   :  { %706 = vmatprep.subr.bf16.mxu0 %v937_v4 }
  0x8f   :  { %707 = vmatpush1.bf16.msra.mxu0 %v935_v5 }
  0x90   :  { %708 = vmatprep.subr.bf16.mxu0 %v940_v6 }
  0x93   :  { %709 = vmatpush1.bf16.msra.mxu0 %v938_v7 }
  0x94   :  { %710 = vmatprep.subr.bf16.mxu0 %v943_v8 }
  0x97   :  { %711 = vmatpush1.bf16.msra.mxu0 %v941_v9 }
  0x98   :  { %712 = vmatprep.subr.bf16.mxu0 %v946_v10 }
  0x9b   :  { %713 = vmatpush1.bf16.msra.mxu0 %v944_v11 }
  0x9c   :  { %714 = vmatprep.subr.bf16.mxu0 %v949_v12 }
  0x9f   :  { %715 = vmatpush1.bf16.msra.mxu0 %v947_v13 }
  0xa0   :  { %716 = vmatprep.subr.bf16.mxu0 %v952_v31 }
  0xa3   :  { %717 = vmatpush1.bf16.msra.mxu0 %v950_v32 }
  0xa4   :  { %718 = vmatprep.subr.bf16.mxu0 %v955_v33 }
  0xa7   :  { %719 = vmatpush1.bf16.msra.mxu0 %v953_v34 }
 0x13d   :  { %v224_v21 = vpop.f32.mrb[0].mxu0 }
 0x13e   :  { %v225_v22 = vadd.f32 %v224_v21, %v103_v19  ;;  %v226_v23 = vpop.f32.mrb[1].mxu0 }
 0x13f   :  { %v227_v24 = vadd.f32 %v226_v23, %v107_v20  ;;  %v228_v25 = vpop.f32.mrb[2].mxu0 }
 0x140   :  { %v231_v26 = vmax.f32 %v225_v22, 0.0  ;;  %v229_v27 = vpop.f32.mrb[3].mxu0 }
 0x141   :  { %v232_v28 = vmax.f32 %v227_v24, 0.0 }
 0x142   :  { %v233_v30 = vpack.c.bf16 %v231_v26, %v231_v26 }
 0x143   :  { %v234_v29 = vpack.c.bf16 %v232_v28, %v232_v28 }
 0x145   :  { %471 = vmatprep.mubr.bf16.mxu1 %v234_v29 }
 0x146   :  { %472 = vmatmul.mubr.bf16.vlgmr.msra.gmra.mrb[0].mxu1 %v233_v30 }
 0x219   :  { %v473_v38 = vpop.f32.mrb[0].mxu1 }
 0x21a   :  { %v474_v39 = vadd.f32 %v473_v38, %v272_v36  ;;  %v475_v40 = vpop.f32.mrb[1].mxu1 }
 0x21b   :  { %v476_v41 = vadd.f32 %v475_v40, %v276_v37  ;;  %v477_v42 = vpop.f32.mrb[2].mxu1 }
 0x21c   :  { %v480_v43 = vmax.f32 %v474_v39, 0.0  ;;  %v478_v44 = vpop.f32.mrb[3].mxu1 }
 0x21d   :  { %v481_v45 = vmax.f32 %v476_v41, 0.0 }
 0x21e   :  { %v482_v47 = vpack.c.bf16 %v480_v43, %v480_v43 }
 0x21f   :  { %v483_v46 = vpack.c.bf16 %v481_v45, %v481_v45 }
 0x221   :  { %720 = vmatprep.mubr.bf16.mxu0 %v483_v46 }
 0x222   :  { %721 = vmatmul.mubr.bf16.vlgmr.msra.gmra.mrb[4].mxu0 %v482_v47 }
 0x2f5   :  { %v722_v51 = vpop.f32.mrb[4].mxu0 }
 0x2f6   :  { %v723_v52 = vadd.f32 %v722_v51, %v521_v49  ;;  %v724_v53 = vpop.f32.mrb[5].mxu0 }
 0x2f7   :  { %v725_v54 = vadd.f32 %v724_v53, %v525_v50  ;;  %v726_v55 = vpop.f32.mrb[6].mxu0 }
 0x2f8   :  { %729 = vst [vmem:[#allocation10] sm:$0xff] %v723_v52  ;;  %v727_v56 = vpop.f32.mrb[7].mxu0 }
 0x2f9   :  { %730 = vst [vmem:[#allocation10 + $0x8] sm:$0xff] %v725_v54 }
 0x2fa   :  { %1055 = shalt.err (!%p1052_p8)
}
 0x2fb   :  { %s1056_s8 = scalar_lea.hbm %s1207_s7, 256 }
 0x2fc   :  { %p1057_p9 = scmp.ne.s32.totalorder %s1207_s7, %s1056_s8  ;;  %p1060_p10 = scmp.lt.u32.totalorder %s1056_s8, %s1207_s7 }
 0x2fe   :  { %p1062_p11 = pnand %p1060_p10, %p1057_p9 }
 0x300   :  { %1065 = shalt.err (!%p1062_p11)
}
 0x301   :  { %740 = dma.vmem_to_hbm [thread:$0]  %s738_s28, 256, %s1207_s7, [#allocation4]  }
 0x302   :  { %1072 = dma.done.wait [#allocation4], 256  }
 0x303   :  { %1073 = vsyncadd [#allocation4], 4294967040 }
 0x304   :  { %744 = vsyncpa [#allocation3], 1 }
 0x305   :  { %745 = vsyncpa [#allocation6], 1 }
 0x306   :  { %746 = vsyncpa [#allocation9], 1 }
 0x307   :  { %747 = vsyncpa [#allocation4], 1 }

</bundles_post_ra>
